<compile_context>
chip_gen: v6e
topology: v6e:2x2x1
jax: 0.10.0
libtpu: 0.0.40
codegen_flags: <defaults>
</compile_context>

<pallas_src>
import jax
import jax.numpy as jnp
from jax.experimental import pallas as pl
from jax.experimental.pallas import tpu as pltpu

_MAX_LANES = 1024  # lane-dense width cap: 8 full vregs wide, multiple of 128


def _cdiv(a, b):
    return -(-a // b)


def _round_up(x, m):
    return _cdiv(x, m) * m


def _sublane_multiple(dtype):
    # Native (sublane, 128) tile: (8,128) for 32-bit, (16,128) for bf16, (32,128) for 8-bit.
    return max(8, 32 // jnp.dtype(dtype).itemsize)


def _block_byte_budget():
    # 4 MiB per block on v6e / v7x (3 refs x 2 buffers = 24 MiB < 32 MiB default scoped
    # VMEM); 2 MiB elsewhere (12 MiB < v5e's 16 MiB default). No vmem_limit override.
    try:
        kind = jax.devices()[0].device_kind.lower()
    except Exception:
        kind = ""
    if any(tag in kind for tag in ("v6", "v7", "7x")):
        return 4 * 1024 * 1024
    return 2 * 1024 * 1024


def _mean_kernel(a1_ref, a2_ref, o_ref):
    # Elementwise average of the two Dirichlet-parameter tiles.
    o_ref[...] = (a1_ref[...] + a2_ref[...]) * 0.5


def _mean_lane_dense(a1_flat, a2_flat, lanes):
    """(a1 + a2) / 2 on flat buffers whose length is a multiple of `lanes`."""
    n = a1_flat.shape[0]
    dtype = a1_flat.dtype
    itemsize = jnp.dtype(dtype).itemsize
    sub = _sublane_multiple(dtype)

    rows = n // lanes
    a1_2d = a1_flat.reshape(rows, lanes)  # contiguous reshape: free
    a2_2d = a2_flat.reshape(rows, lanes)

    cap_rows = max(sub, (_block_byte_budget() // (lanes * itemsize)) // sub * sub)
    if rows <= sub:
        tile_rows = rows  # single exact block (block dims == array dims: always legal)
    else:
        # Target ~8 grid steps so v7x's second TensorCore participates and the
        # DMA/compute pipeline has something to overlap; never exceed the VMEM budget.
        tile_rows = max(sub, min(cap_rows, _round_up(_cdiv(rows, 8), sub)))
    grid = (_cdiv(rows, tile_rows),)  # uneven last block is masked by Pallas (no padding)

    out = pl.pallas_call(
        _mean_kernel,
        out_shape=jax.ShapeDtypeStruct((rows, lanes), dtype),
        grid_spec=pltpu.PrefetchScalarGridSpec(
            num_scalar_prefetch=0,
            grid=grid,
            in_specs=[
                pl.BlockSpec((tile_rows, lanes), lambda i: (i, 0)),
                pl.BlockSpec((tile_rows, lanes), lambda i: (i, 0)),
            ],
            out_specs=pl.BlockSpec((tile_rows, lanes), lambda i: (i, 0)),
        ),
        compiler_params=pltpu.CompilerParams(
            dimension_semantics=("parallel",),
            # Let XLA fuse the transpose/reshape producers into the kernel's input DMA
            # instead of materializing a transposed copy of alpha1 in HBM.
            allow_input_fusion=[True, True],
        ),
        cost_estimate=pl.CostEstimate(
            flops=2 * n,
            transcendentals=0,
            bytes_accessed=3 * n * itemsize,
        ),
    )(a1_2d, a2_2d)

    return out.reshape(-1)


def _mean_flat(a1_flat, a2_flat):
    """Elementwise (a1 + a2) / 2 over flat 1-D buffers via a lane-dense Pallas kernel."""
    n = a1_flat.shape[0]

    # Largest lane width (multiple of 128, <= 1024) that divides n -> no pad, no slice.
    for lanes in (1024, 512, 256, 128):
        if n > 0 and n % lanes == 0:
            return _mean_lane_dense(a1_flat, a2_flat, lanes)

    # Ragged case (n not a multiple of 128): kernel on the 1024-aligned prefix, the
    # <1024-element tail in plain jnp.
    # TODO(synk): the concatenate re-writes the output once; acceptable for this rare path.
    n_main = (n // _MAX_LANES) * _MAX_LANES
    if n_main == 0:
        return (a1_flat + a2_flat) * 0.5  # < 1024 elements: not worth a kernel launch
    head = _mean_lane_dense(a1_flat[:n_main], a2_flat[:n_main], _MAX_LANES)
    tail = (a1_flat[n_main:] + a2_flat[n_main:]) * 0.5
    return jnp.concatenate([head, tail])


def mean_uncertainty(alpha1, alpha2, n_classes):
    """JAX/Pallas port of MeanUncertainty.forward.

    alpha1, alpha2: NCHW [B, n_classes, H, W] or 2-D [N, n_classes].
    Returns [B*H*W, n_classes] (or [N, n_classes]) = (alpha1 + alpha2) / 2,
    with the original module's reshape semantics (including its alpha2 typo) preserved.
    """
    assert alpha1.ndim in (2, 4)
    assert alpha2.ndim in (2, 4)
    assert alpha1.shape == alpha2.shape
    assert alpha1.shape[1] == n_classes
    assert alpha2.shape[1] == n_classes

    if alpha1.ndim == 4:
        # alpha1: NCHW -> NHWC -> [B*H*W, C].  The transpose is left to XLA, but
        # allow_input_fusion lets it fuse into the kernel's input DMA when possible.
        # TODO(synk): a fully in-kernel (C, tile_h*W) -> interleaved (tile_h*W*C,) relayout
        # would guarantee zero extra HBM traffic, but the required in-kernel reshape across
        # the lane dimension does not lower robustly for small n_classes; left to XLA.
        a1 = jnp.transpose(alpha1, (0, 2, 3, 1)).reshape(-1, n_classes)
        # alpha2: reproduces the upstream typo -- reshaped directly from NCHW.
        a2 = alpha2.reshape(-1, n_classes)
    else:
        a1, a2 = alpha1, alpha2

    out_rows = a1.shape[0]
    res = _mean_flat(a1.reshape(-1), a2.reshape(-1))
    return res.reshape(out_rows, n_classes)


if __name__ == "__main__":
    n_classes = 4
    key = jax.random.PRNGKey(0)
    k1, k2, k3, k4 = jax.random.split(key, 4)

    # 4-D (NCHW) path: B=2, C=4, H=W=16.  Dirichlet params are positive -> exp of normals.
    B, C, H, W = 2, n_classes, 16, 16
    alpha1 = jnp.exp(jax.random.normal(k1, (B, C, H, W), dtype=jnp.float32))
    alpha2 = jnp.exp(jax.random.normal(k2, (B, C, H, W), dtype=jnp.float32))
    out = jax.block_until_ready(mean_uncertainty(alpha1, alpha2, n_classes))
    ref = (jnp.transpose(alpha1, (0, 2, 3, 1)).reshape(-1, n_classes)
           + alpha2.reshape(-1, n_classes)) * 0.5
    assert out.shape == (B * H * W, n_classes)
    assert jnp.allclose(out, ref, atol=1e-6, rtol=1e-6)

    # 2-D path exercising the masked partial final block (n=1408 -> lanes=128, rows=11,
    # tile_rows=8, grid=2, last block masked by Pallas -- no padding anywhere).
    a1_2d = jnp.exp(jax.random.normal(k3, (352, n_classes), dtype=jnp.float32))
    a2_2d = jnp.exp(jax.random.normal(k4, (352, n_classes), dtype=jnp.float32))
    out2 = jax.block_until_ready(mean_uncertainty(a1_2d, a2_2d, n_classes))
    assert out2.shape == (352, n_classes)
    assert jnp.allclose(out2, (a1_2d + a2_2d) * 0.5, atol=1e-6, rtol=1e-6)

    print("KERNEL_OK")
</pallas_src>

<mosaic_0001>
module attributes {stable_mosaic.version = 11 : i64} {
  func.func @_mean_kernel(%arg0: i32, %arg1: memref<2x1024xf32, #tpu.memory_space<vmem>>, %arg2: memref<2x1024xf32, #tpu.memory_space<vmem>>, %arg3: memref<2x1024xf32, #tpu.memory_space<vmem>>) attributes {dimension_semantics = [#tpu.dimension_semantics<parallel>], iteration_bounds = array<i64: 1>, scalar_prefetch = 0 : i64, scratch_operands = 0 : i64, tpu.core_type = #tpu.core_type<tc>, window_params = [{transform_indices = @transform_0, window_bounds = array<i64: 2, 1024>}, {transform_indices = @transform_1, window_bounds = array<i64: 2, 1024>}, {transform_indices = @transform_2, window_bounds = array<i64: 2, 1024>}]} {
    %c0 = arith.constant 0 : index
    %c0_0 = arith.constant 0 : index
    %0 = vector.load %arg1[%c0, %c0_0] : memref<2x1024xf32, #tpu.memory_space<vmem>>, vector<2x1024xf32>
    %c0_1 = arith.constant 0 : index
    %c0_2 = arith.constant 0 : index
    %1 = vector.load %arg2[%c0_1, %c0_2] : memref<2x1024xf32, #tpu.memory_space<vmem>>, vector<2x1024xf32>
    %2 = arith.addf %0, %1 : vector<2x1024xf32>
    %cst = arith.constant 5.000000e-01 : f32
    %3 = vector.broadcast %cst : f32 to vector<2x1024xf32>
    %4 = arith.mulf %2, %3 : vector<2x1024xf32>
    %c0_3 = arith.constant 0 : index
    %c0_4 = arith.constant 0 : index
    %5 = vector.load %arg3[%c0_3, %c0_4] : memref<2x1024xf32, #tpu.memory_space<vmem>>, vector<2x1024xf32>
    tpu.vector_store %arg3[%c0_3, %c0_4], %4 {strides = array<i32>} : memref<2x1024xf32, #tpu.memory_space<vmem>>, vector<2x1024xf32>,
    return
  }
  func.func @transform_0(%arg0: i32) -> (i32, i32) {
    %c0_i32 = arith.constant 0 : i32
    %c0_i32_0 = arith.constant 0 : i32
    return %arg0, %c0_i32 : i32, i32
  }
  func.func @transform_1(%arg0: i32) -> (i32, i32) {
    %c0_i32 = arith.constant 0 : i32
    %c0_i32_0 = arith.constant 0 : i32
    return %arg0, %c0_i32 : i32, i32
  }
  func.func @transform_2(%arg0: i32) -> (i32, i32) {
    %c0_i32 = arith.constant 0 : i32
    %c0_i32_0 = arith.constant 0 : i32
    return %arg0, %c0_i32 : i32, i32
  }
}

</mosaic_0001>

<bundles_post_ra>
// kernel: tpu_custom_call.1
= control target key start
LH: loop header
LB: loop body
LE: loop exit
PB: predicated region body
PF: predicated region fallthrough
CT: control target
= control target key end

     0   :  { %7 = vsyncpa [#allocation3], 0  ;;  %s158_s0 = inlined_call_operand.hbm [shape: f32[2,1024], index: 0, kind: input, shape index: {}]   ;;  %s159_s1 = inlined_call_operand.hbm [shape: f32[2,1024], index: 1, kind: input, shape index: {}]   ;;  %s160_s2 = inlined_call_operand.hbm [shape: f32[2,1024], index: 2, kind: output, shape index: {}]  }
   0x1   :  { %8 = vsyncpa [#allocation6], 0 }
   0x2   :  { %9 = vsyncpa [#allocation4], 0  ;;  %s131_s9 = smov [#allocation2]   ;;  %s132_s11 = smov [#allocation5]  }
   0x3   :  { %s16_s10 = sshll.u32 %s131_s9, 4  ;;  %s26_s12 = sshll.u32 %s132_s11, 4  ;;  %s17_s10 = int_to_ptr.vmem [resolvable:$true] %s16_s10  ;;  %s27_s12 = int_to_ptr.vmem [resolvable:$true] %s26_s12 }
   0x4   :  { %s73_s13 = scalar_lea.vmem %s17_s10, 256  ;;  %p78_p1 = scmp.lt.s32.totalorder %s17_s10, %s17_s10 }
   0x5   :  { %p74_p0 = scmp.ne.s32.totalorder %s17_s10, %s73_s13  ;;  %p79_p2 = scmp.lt.s32.totalorder %s73_s13, %s73_s13 }
   0x7   :  { %p80_p3 = por %p79_p2, %p78_p1 }
   0x9   :  { %p81_p4 = pnand %p80_p3, %p74_p0 }
   0xb   :  { %84 = shalt.err (!%p81_p4)
}
   0xc   :  { %19 = dma.hbm_to_vmem [thread:$0]  %s158_s0, 256, %s17_s10, [#allocation3]  }
   0xd   :  { %s93_s16 = scalar_lea.vmem %s27_s12, 256  ;;  %p98_p6 = scmp.lt.s32.totalorder %s27_s12, %s27_s12 }
   0xe   :  { %p94_p5 = scmp.ne.s32.totalorder %s27_s12, %s93_s16  ;;  %p99_p7 = scmp.lt.s32.totalorder %s93_s16, %s93_s16 }
  0x10   :  { %p100_p8 = por %p99_p7, %p98_p6 }
  0x12   :  { %p101_p9 = pnand %p100_p8, %p94_p5 }
  0x14   :  { %104 = shalt.err (!%p101_p9)
}
  0x15   :  { %29 = dma.hbm_to_vmem [thread:$0]  %s159_s1, 256, %s27_s12, [#allocation6]  }
  0x16   :  { %125 = dma.done.wait [#allocation3], 256  }
  0x17   :  { %126 = vsyncadd [#allocation3], 4294967040 }
  0x18   :  { %127 = dma.done.wait [#allocation6], 256  }
  0x19   :  { %128 = vsyncadd [#allocation6], 4294967040  ;;  %v36_v0 = vld [vmem:[#allocation2] sm:$0xff]  ;;  %v38_v1 = vld [vmem:[#allocation5] sm:$0xff]  ;;  %s133_s0 = smov [#allocation7]  }
  0x1a   :  { %v37_v2 = vld [vmem:[#allocation2 + $0x8] sm:$0xff]  ;;  %v40_v3 = vadd.f32 %v38_v1, %v36_v0  ;;  %v39_v4 = vld [vmem:[#allocation5 + $0x8] sm:$0xff]  ;;  %s52_s19 = sshll.u32 %s133_s0, 4  ;;  %s53_s19 = int_to_ptr.vmem [resolvable:$true] %s52_s19 }
  0x1b   :  { %v41_v5 = vadd.f32 %v39_v4, %v37_v2  ;;  %s105_s20 = scalar_lea.vmem %s53_s19, 256  ;;  %p110_p11 = scmp.lt.s32.totalorder %s53_s19, %s53_s19 }
  0x1c   :  { %v42_v6 = vmul.f32 0.5, %v40_v3  ;;  %p106_p10 = scmp.ne.s32.totalorder %s53_s19, %s105_s20  ;;  %p111_p12 = scmp.lt.s32.totalorder %s105_s20, %s105_s20 }
  0x1d   :  { %v43_v7 = vmul.f32 0.5, %v41_v5 }
  0x1e   :  { %44 = vst [vmem:[#allocation7] sm:$0xff] %v42_v6  ;;  %p112_p13 = por %p111_p12, %p110_p11 }
  0x1f   :  { %45 = vst [vmem:[#allocation7 + $0x8] sm:$0xff] %v43_v7 }
  0x20   :  { %p113_p0 = pnand %p112_p13, %p106_p10 }
  0x22   :  { %116 = shalt.err (!%p113_p0)
}
  0x23   :  { %55 = dma.vmem_to_hbm [thread:$0]  %s53_s19, 256, %s160_s2, [#allocation4]  }
  0x24   :  { %129 = dma.done.wait [#allocation4], 256  }
  0x25   :  { %130 = vsyncadd [#allocation4], 4294967040 }
  0x26   :  { %59 = vsyncpa [#allocation3], 1 }
  0x27   :  { %60 = vsyncpa [#allocation6], 1 }
  0x28   :  { %61 = vsyncpa [#allocation4], 1 }

</bundles_post_ra>
